<compile_context>
chip_gen: v7x
topology: tpu7x:2x2x1
jax: 0.10.0
libtpu: 0.0.40
codegen_flags: <defaults>
</compile_context>

<pallas_src>
import functools
import math

import jax
import jax.numpy as jnp
from jax import lax
from jax.experimental import pallas as pl
from jax.experimental.pallas import tpu as pltpu


def _round_up(x, m):
    return (x + m - 1) // m * m


def _cdiv(a, b):
    return (a + b - 1) // b


def _vmem_budget_bytes():
    """Scoped-VMEM budget: ~half of physical (64 MiB v5e/v6e, 32 MiB v7x)."""
    cap = 64 * 1024 * 1024  # conservative fallback, safe on every generation
    try:
        info = pltpu.get_tpu_info()
        cap = int(getattr(info, "vmem_capacity_bytes", cap))
    except Exception:
        pass
    return max(16 * 1024 * 1024, cap // 2)


def _select_tiles(B, V, D, w_itemsize, usable_bytes, block_v=None):
    """Pick (tb, block_v).  Maximize tb first (cuts table re-streams, the
    dominant HBM term), then block_v (amortizes ~0.35us per grid step)."""
    v_cap = _round_up(V, 256)
    tb_cap = _round_up(B, 8)
    if B >= 256:
        # Keep >= 2 batch tiles so the 'parallel' axis can shard across
        # TensorCores (matters on v7x's 2-TC chips).
        tb_cap = min(tb_cap, _round_up(_cdiv(B, 2), 128))

    tb_opts = [t for t in (512, 256, 128, 64, 32, 16, 8) if t <= tb_cap] or [8]
    if block_v is not None:
        bv_opts = [min(_round_up(max(block_v, 256), 256), v_cap)]
    elif V <= 256:
        bv_opts = [V]  # single full-extent vocab block, no mask needed
    else:
        bv_opts = [b for b in (8192, 4096, 2048, 1024, 512, 256) if b <= v_cap] or [256]

    def fits(tb, bv):
        need = (2 * bv * D * w_itemsize     # double-buffered W stream
                + 2 * tb * D * 4            # double-buffered center tile
                + 3 * tb * bv * 4)          # f32 logits + elementwise temps
        return need <= usable_bytes

    for tb in tb_opts:
        for bv in bv_opts:
            if fits(tb, bv):
                return tb, bv
    return tb_opts[-1], bv_opts[-1]


def _lse_kernel(center_ref, w_ref, lse_ref, m_sc, s_sc, *,
                block_v, vocab, needs_mask):
    """center_ref: [tb, D] f32, w_ref: [block_v, D] (bf16), lse_ref: [tb, 1]."""
    v = pl.program_id(1)
    nv = pl.num_programs(1)

    @pl.when(v == 0)
    def _init():
        m_sc[...] = jnp.full_like(m_sc, -jnp.inf)
        s_sc[...] = jnp.zeros_like(s_sc)

    c = center_ref[...].astype(jnp.bfloat16)
    w = w_ref[...].astype(jnp.bfloat16)   # no-op when the table is stored bf16
    # Contract the last dims of both operands -> no XLU transpose of the
    # [block_v, D] tile; MXU accumulates in f32.
    logits = lax.dot_general(
        c, w, dimension_numbers=(((1,), (1,)), ((), ())),
        preferred_element_type=jnp.float32)                    # [tb, block_v]

    def _update(lg):
        m_prev = m_sc[...]
        m_new = jnp.maximum(m_prev, jnp.max(lg, axis=1, keepdims=True))
        s_sc[...] = (s_sc[...] * jnp.exp(m_prev - m_new)
                     + jnp.sum(jnp.exp(lg - m_new), axis=1, keepdims=True))
        m_sc[...] = m_new

    if needs_mask:
        # Mask cost is paid only on the last (partial) vocab tile.  It is
        # REQUIRED there: the edge block's out-of-bounds rows are
        # uninitialized VMEM and must not reach the logsumexp.
        @pl.when(v == nv - 1)
        def _masked():
            col = lax.broadcasted_iota(jnp.int32, logits.shape, 1) + v * block_v
            _update(jnp.where(col < vocab, logits, -jnp.inf))

        @pl.when(v != nv - 1)
        def _unmasked():
            _update(logits)
    else:
        _update(logits)

    @pl.when(v == nv - 1)
    def _finalize():
        lse_ref[...] = m_sc[...] + jnp.log(s_sc[...])


def wordvec_logsumexp(center, context_weight, *, block_v=None):
    """center: [B, D] f32, context_weight: [V, D] (bf16 preferred) -> lse [B]."""
    B, D = center.shape
    V, D2 = context_weight.shape
    assert D == D2
    w_itemsize = jnp.dtype(context_weight.dtype).itemsize

    vmem_limit = _vmem_budget_bytes()
    tb, bv = _select_tiles(B, V, D, w_itemsize, (vmem_limit * 3) // 4,
                           block_v=block_v)

    # Pad only the tiny [B, D] center operand (never the [V, D] table) so the
    # batch axis tiles evenly and the f32 logits tile stays within budget.
    b_pad = _round_up(B, tb)
    c = center if b_pad == B else jnp.pad(center, ((0, b_pad - B), (0, 0)))

    nb = b_pad // tb
    nv = _cdiv(V, bv)
    needs_mask = (V % bv) != 0

    kernel = functools.partial(_lse_kernel, block_v=bv, vocab=V,
                               needs_mask=needs_mask)

    lse = pl.pallas_call(
        kernel,
        out_shape=jax.ShapeDtypeStruct((b_pad, 1), jnp.float32),
        grid_spec=pltpu.PrefetchScalarGridSpec(
            num_scalar_prefetch=0,
            grid=(nb, nv),
            in_specs=[
                pl.BlockSpec((tb, D), lambda i, v: (i, 0)),   # center rows
                pl.BlockSpec((bv, D), lambda i, v: (v, 0)),   # W_context tile
            ],
            out_specs=pl.BlockSpec((tb, 1), lambda i, v: (i, 0)),
            scratch_shapes=[
                pltpu.VMEM((tb, 1), jnp.float32),   # running max m
                pltpu.VMEM((tb, 1), jnp.float32),   # running (rescaled) sum s
            ],
        ),
        compiler_params=pltpu.CompilerParams(
            dimension_semantics=("parallel", "arbitrary"),
            vmem_limit_bytes=vmem_limit,
        ),
        cost_estimate=pl.CostEstimate(
            flops=2 * b_pad * V * D,
            transcendentals=b_pad * V,
            # The [V, D] table is re-streamed once per batch tile.
            bytes_accessed=(nb * V * D * w_itemsize + b_pad * D * 4 + b_pad * 4),
        ),
    )(c, context_weight)
    return lse[:B, 0]


def wordvec_nll_loss(center_vecs, context_vecs, context_weight, *, block_v=None):
    """center/context_vecs: [B, D] f32, context_weight: [V, D] -> scalar loss."""
    lse = wordvec_logsumexp(center_vecs, context_weight, block_v=block_v)
    # Tiny per-example dot + mean stay in XLA so they fuse with neighbours.
    dot = jnp.sum(center_vecs * context_vecs, axis=1)
    return jnp.mean(lse - dot)


class WordVecJax:
    """JAX/Pallas port of the PyTorch WordVec module (loss_func='nll' path)."""

    def __init__(self, V, embedding_dim, loss_func, key, *, block_v=None):
        std = 1.0 / math.sqrt(embedding_dim)
        k1, k2 = jax.random.split(key)
        w_center = jax.random.normal(k1, (V, embedding_dim), jnp.float32) * std
        w_context = jax.random.normal(k2, (V, embedding_dim), jnp.float32) * std
        # Mimic the in-place clamps in the PyTorch __init__.
        self.center_weight = jnp.clip(w_center, -1.0, 1.0)
        self.context_weight = jnp.clip(w_context, -1.0 + 1e-10, 1.0 - 1e-10)
        # bf16 copy of the big table, created once: the kernel streams this
        # from HBM (the kernel is HBM-bound on this stream; bf16 halves it).
        self.context_weight_stream = self.context_weight.astype(jnp.bfloat16)
        self.loss_func = loss_func
        self.block_v = block_v

    def __call__(self, center_word, context_word):
        if self.loss_func == 'nll':
            return self.negative_log_likelihood_loss(center_word, context_word)
        elif self.loss_func == 'neg':
            # TODO(synk): 'neg' path uses host-side np.random.choice negative
            # sampling; not implemented as a deterministic Pallas kernel here.
            raise NotImplementedError("negative sampling path not implemented")
        else:
            raise Exception('No implementation found for %s' % self.loss_func)

    def negative_log_likelihood_loss(self, center_word, context_word):
        # TODO(synk): embedding row gathers remain plain-JAX glue; they could
        # be fused into the kernel with PrefetchScalarGridSpec + pl.Element.
        center = jnp.take(self.center_weight, center_word, axis=0)     # [B, D]
        context = jnp.take(self.context_weight, context_word, axis=0)  # [B, D]
        lse = wordvec_logsumexp(center, self.context_weight_stream,
                                block_v=self.block_v)
        dot = jnp.sum(center * context, axis=1)
        return jnp.mean(lse - dot)


if __name__ == "__main__":
    V = 1000          # vocabulary size (not a tile multiple -> exercises the edge-block mask)
    D = 128           # embedding_dim (lane-aligned)
    B = 8             # batch of (center, context) pairs

    key = jax.random.PRNGKey(0)
    k_model, k_center, k_context = jax.random.split(key, 3)

    # block_v=256 forces several vocab tiles so the online-logsumexp
    # accumulator, the last-tile-only mask and the edge block are exercised.
    model = WordVecJax(V, D, loss_func='nll', key=k_model, block_v=256)

    center_word = jax.random.randint(k_center, (B,), 0, V, dtype=jnp.int32)
    context_word = jax.random.randint(k_context, (B,), 0, V, dtype=jnp.int32)

    loss = jax.block_until_ready(model(center_word, context_word))

    center = jnp.take(model.center_weight, center_word, axis=0)
    context = jnp.take(model.context_weight, context_word, axis=0)
    dot = jnp.sum(center * context, axis=1)

    # Reference 1: mirrors the kernel's bf16 matmul operands (f32 accumulate)
    # -> tight check of the tiled online-logsumexp + edge-block mask logic.
    logits_bf16 = jnp.einsum('bd,vd->bv',
                             center.astype(jnp.bfloat16),
                             model.context_weight_stream,
                             preferred_element_type=jnp.float32)
    ref_bf16 = jnp.mean(jax.scipy.special.logsumexp(logits_bf16, axis=1) - dot)
    ref_bf16 = jax.block_until_ready(ref_bf16)
    assert jnp.allclose(loss, ref_bf16, rtol=1e-4, atol=1e-4), (loss, ref_bf16)

    # Reference 2: pure-f32 original semantics -> loose check (only difference
    # is the bf16 cast of the matmul operands).
    logits_f32 = center @ model.context_weight.T
    ref_f32 = jnp.mean(jax.scipy.special.logsumexp(logits_f32, axis=1) - dot)
    ref_f32 = jax.block_until_ready(ref_f32)
    assert jnp.allclose(loss, ref_f32, rtol=2e-2, atol=2e-2), (loss, ref_f32)

    print("KERNEL_OK")
</pallas_src>

<mosaic_0001>
module attributes {stable_mosaic.version = 11 : i64} {
  func.func @_lse_kernel(%arg0: i32, %arg1: i32, %arg2: memref<8x128xf32, #tpu.memory_space<vmem>>, %arg3: memref<256x128xbf16, #tpu.memory_space<vmem>>, %arg4: memref<8x1xf32, #tpu.memory_space<vmem>>, %arg5: memref<8x1xf32, #tpu.memory_space<vmem>>, %arg6: memref<8x1xf32, #tpu.memory_space<vmem>>) attributes {dimension_semantics = [#tpu.dimension_semantics<parallel>, #tpu.dimension_semantics<arbitrary>], iteration_bounds = array<i64: 1, 4>, scalar_prefetch = 0 : i64, scratch_operands = 2 : i64, tpu.core_type = #tpu.core_type<tc>, window_params = [{transform_indices = @transform_0, window_bounds = array<i64: 8, 128>}, {transform_indices = @transform_1, window_bounds = array<i64: 256, 128>}, {transform_indices = @transform_2, window_bounds = array<i64: 8, 1>}]} {
    %c0_i32 = arith.constant 0 : i32
    %0 = arith.cmpi eq, %arg1, %c0_i32 : i32
    %1 = arith.extui %0 : i1 to i32
    %c0_i32_0 = arith.constant 0 : i32
    %2 = arith.cmpi ne, %1, %c0_i32_0 : i32
    scf.if %2 {
      %cst_9 = arith.constant 0xFF800000 : f32
      %16 = vector.broadcast %cst_9 : f32 to vector<8x1xf32>
      %c0_10 = arith.constant 0 : index
      %c0_11 = arith.constant 0 : index
      %17 = vector.load %arg5[%c0_10, %c0_11] : memref<8x1xf32, #tpu.memory_space<vmem>>, vector<8x1xf32>
      tpu.vector_store %arg5[%c0_10, %c0_11], %16 {strides = array<i32>} : memref<8x1xf32, #tpu.memory_space<vmem>>, vector<8x1xf32>,
      %cst_12 = arith.constant 0.000000e+00 : f32
      %18 = vector.broadcast %cst_12 : f32 to vector<8x1xf32>
      %c0_13 = arith.constant 0 : index
      %c0_14 = arith.constant 0 : index
      %19 = vector.load %arg6[%c0_13, %c0_14] : memref<8x1xf32, #tpu.memory_space<vmem>>, vector<8x1xf32>
      tpu.vector_store %arg6[%c0_13, %c0_14], %18 {strides = array<i32>} : memref<8x1xf32, #tpu.memory_space<vmem>>, vector<8x1xf32>,
    } else {
    }
    %c0 = arith.constant 0 : index
    %c0_1 = arith.constant 0 : index
    %3 = vector.load %arg2[%c0, %c0_1] : memref<8x128xf32, #tpu.memory_space<vmem>>, vector<8x128xf32>
    %4 = arith.truncf %3 : vector<8x128xf32> to vector<8x128xbf16>
    %c0_2 = arith.constant 0 : index
    %c0_3 = arith.constant 0 : index
    %5 = vector.load %arg3[%c0_2, %c0_3] : memref<256x128xbf16, #tpu.memory_space<vmem>>, vector<256x128xbf16>
    %cst = arith.constant dense<0.000000e+00> : vector<8x256xf32>
    %6 = tpu.matmul %4, %5, %cst {dimension_numbers = #tpu.dot_dimension_numbers<[1], [1], [0], [0], [0, 0, 1, 0], [], []>} : vector<8x128xbf16>, vector<256x128xbf16>, vector<8x256xf32> -> vector<8x256xf32>
    %c3_i32 = arith.constant 3 : i32
    %7 = arith.cmpi eq, %arg1, %c3_i32 : i32
    %8 = arith.extui %7 : i1 to i32
    %c0_i32_4 = arith.constant 0 : i32
    %9 = arith.cmpi ne, %8, %c0_i32_4 : i32
    scf.if %9 {
      %16 = tpu.iota {dimensions = array<i32: 1>} : vector<8x256xi32>
      %c256_i32 = arith.constant 256 : i32
      %17 = arith.muli %arg1, %c256_i32 : i32
      %18 = vector.broadcast %17 : i32 to vector<8x256xi32>
      %19 = arith.addi %16, %18 : vector<8x256xi32>
      %c1000_i32 = arith.constant 1000 : i32
      %20 = vector.broadcast %c1000_i32 : i32 to vector<8x256xi32>
      %21 = arith.cmpi slt, %19, %20 : vector<8x256xi32>
      %cst_9 = arith.constant 0xFF800000 : f32
      %22 = vector.broadcast %cst_9 : f32 to vector<8x256xf32>
      %23 = arith.select %21, %6, %22 : vector<8x256xi1>, vector<8x256xf32>
      %c0_10 = arith.constant 0 : index
      %c0_11 = arith.constant 0 : index
      %24 = vector.load %arg5[%c0_10, %c0_11] : memref<8x1xf32, #tpu.memory_space<vmem>>, vector<8x1xf32>
      %cst_12 = arith.constant dense<0xFF800000> : vector<8xf32>
      %25 = vector.multi_reduction <maximumf>, %23, %cst_12 [1] : vector<8x256xf32> to vector<8xf32>
      %26 = vector.shape_cast %25 : vector<8xf32> to vector<8x1xf32>
      %27 = arith.maximumf %24, %26 : vector<8x1xf32>
      %c0_13 = arith.constant 0 : index
      %c0_14 = arith.constant 0 : index
      %28 = vector.load %arg6[%c0_13, %c0_14] : memref<8x1xf32, #tpu.memory_space<vmem>>, vector<8x1xf32>
      %29 = arith.subf %24, %27 : vector<8x1xf32>
      %30 = math.exp %29 : vector<8x1xf32>
      %31 = arith.mulf %28, %30 : vector<8x1xf32>
      %32 = vector.broadcast %27 : vector<8x1xf32> to vector<8x256xf32>
      %33 = arith.subf %23, %32 : vector<8x256xf32>
      %34 = math.exp %33 : vector<8x256xf32>
      %cst_15 = arith.constant dense<0.000000e+00> : vector<8xf32>
      %35 = vector.multi_reduction <add>, %34, %cst_15 [1] : vector<8x256xf32> to vector<8xf32>
      %36 = vector.shape_cast %35 : vector<8xf32> to vector<8x1xf32>
      %37 = arith.addf %31, %36 : vector<8x1xf32>
      %c0_16 = arith.constant 0 : index
      %c0_17 = arith.constant 0 : index
      %38 = vector.load %arg6[%c0_16, %c0_17] : memref<8x1xf32, #tpu.memory_space<vmem>>, vector<8x1xf32>
      tpu.vector_store %arg6[%c0_16, %c0_17], %37 {strides = array<i32>} : memref<8x1xf32, #tpu.memory_space<vmem>>, vector<8x1xf32>,
      %c0_18 = arith.constant 0 : index
      %c0_19 = arith.constant 0 : index
      %39 = vector.load %arg5[%c0_18, %c0_19] : memref<8x1xf32, #tpu.memory_space<vmem>>, vector<8x1xf32>
      tpu.vector_store %arg5[%c0_18, %c0_19], %27 {strides = array<i32>} : memref<8x1xf32, #tpu.memory_space<vmem>>, vector<8x1xf32>,
    } else {
    }
    %c3_i32_5 = arith.constant 3 : i32
    %10 = arith.cmpi ne, %arg1, %c3_i32_5 : i32
    %11 = arith.extui %10 : i1 to i32
    %c0_i32_6 = arith.constant 0 : i32
    %12 = arith.cmpi ne, %11, %c0_i32_6 : i32
    scf.if %12 {
      %c0_9 = arith.constant 0 : index
      %c0_10 = arith.constant 0 : index
      %16 = vector.load %arg5[%c0_9, %c0_10] : memref<8x1xf32, #tpu.memory_space<vmem>>, vector<8x1xf32>
      %cst_11 = arith.constant dense<0xFF800000> : vector<8xf32>
      %17 = vector.multi_reduction <maximumf>, %6, %cst_11 [1] : vector<8x256xf32> to vector<8xf32>
      %18 = vector.shape_cast %17 : vector<8xf32> to vector<8x1xf32>
      %19 = arith.maximumf %16, %18 : vector<8x1xf32>
      %c0_12 = arith.constant 0 : index
      %c0_13 = arith.constant 0 : index
      %20 = vector.load %arg6[%c0_12, %c0_13] : memref<8x1xf32, #tpu.memory_space<vmem>>, vector<8x1xf32>
      %21 = arith.subf %16, %19 : vector<8x1xf32>
      %22 = math.exp %21 : vector<8x1xf32>
      %23 = arith.mulf %20, %22 : vector<8x1xf32>
      %24 = vector.broadcast %19 : vector<8x1xf32> to vector<8x256xf32>
      %25 = arith.subf %6, %24 : vector<8x256xf32>
      %26 = math.exp %25 : vector<8x256xf32>
      %cst_14 = arith.constant dense<0.000000e+00> : vector<8xf32>
      %27 = vector.multi_reduction <add>, %26, %cst_14 [1] : vector<8x256xf32> to vector<8xf32>
      %28 = vector.shape_cast %27 : vector<8xf32> to vector<8x1xf32>
      %29 = arith.addf %23, %28 : vector<8x1xf32>
      %c0_15 = arith.constant 0 : index
      %c0_16 = arith.constant 0 : index
      %30 = vector.load %arg6[%c0_15, %c0_16] : memref<8x1xf32, #tpu.memory_space<vmem>>, vector<8x1xf32>
      tpu.vector_store %arg6[%c0_15, %c0_16], %29 {strides = array<i32>} : memref<8x1xf32, #tpu.memory_space<vmem>>, vector<8x1xf32>,
      %c0_17 = arith.constant 0 : index
      %c0_18 = arith.constant 0 : index
      %31 = vector.load %arg5[%c0_17, %c0_18] : memref<8x1xf32, #tpu.memory_space<vmem>>, vector<8x1xf32>
      tpu.vector_store %arg5[%c0_17, %c0_18], %19 {strides = array<i32>} : memref<8x1xf32, #tpu.memory_space<vmem>>, vector<8x1xf32>,
    } else {
    }
    %c3_i32_7 = arith.constant 3 : i32
    %13 = arith.cmpi eq, %arg1, %c3_i32_7 : i32
    %14 = arith.extui %13 : i1 to i32
    %c0_i32_8 = arith.constant 0 : i32
    %15 = arith.cmpi ne, %14, %c0_i32_8 : i32
    scf.if %15 {
      %c0_9 = arith.constant 0 : index
      %c0_10 = arith.constant 0 : index
      %16 = vector.load %arg5[%c0_9, %c0_10] : memref<8x1xf32, #tpu.memory_space<vmem>>, vector<8x1xf32>
      %c0_11 = arith.constant 0 : index
      %c0_12 = arith.constant 0 : index
      %17 = vector.load %arg6[%c0_11, %c0_12] : memref<8x1xf32, #tpu.memory_space<vmem>>, vector<8x1xf32>
      %18 = math.log %17 : vector<8x1xf32>
      %19 = arith.addf %16, %18 : vector<8x1xf32>
      %c0_13 = arith.constant 0 : index
      %c0_14 = arith.constant 0 : index
      %20 = vector.load %arg4[%c0_13, %c0_14] : memref<8x1xf32, #tpu.memory_space<vmem>>, vector<8x1xf32>
      tpu.vector_store %arg4[%c0_13, %c0_14], %19 {strides = array<i32>} : memref<8x1xf32, #tpu.memory_space<vmem>>, vector<8x1xf32>,
    } else {
    }
    return
  }
  func.func @transform_0(%arg0: i32, %arg1: i32) -> (i32, i32) {
    %c0_i32 = arith.constant 0 : i32
    %c0_i32_0 = arith.constant 0 : i32
    return %arg0, %c0_i32 : i32, i32
  }
  func.func @transform_1(%arg0: i32, %arg1: i32) -> (i32, i32) {
    %c0_i32 = arith.constant 0 : i32
    %c0_i32_0 = arith.constant 0 : i32
    return %arg1, %c0_i32 : i32, i32
  }
  func.func @transform_2(%arg0: i32, %arg1: i32) -> (i32, i32) {
    %c0_i32 = arith.constant 0 : i32
    %c0_i32_0 = arith.constant 0 : i32
    return %arg0, %c0_i32 : i32, i32
  }
}

</mosaic_0001>

<bundles_post_ra>
// kernel: tpu_custom_call.1
= control target key start
LH: loop header
LB: loop body
LE: loop exit
PB: predicated region body
PF: predicated region fallthrough
CT: control target
= control target key end

     0   :  { %7 = vsyncpa [#allocation5], 0  ;;  %s1046_s0 = inlined_call_operand.hbm [shape: f32[8,128], index: 0, kind: input, shape index: {}]   ;;  %s1047_s1 = inlined_call_operand.hbm [shape: bf16[1000,128], index: 1, kind: input, shape index: {}]   ;;  %s1048_s2 = inlined_call_operand.vmem [shape: f32[8,1], index: 2, kind: output, shape index: {}]  }
   0x1   :  { %8 = vsyncpa [#allocation7], 0 }
   0x2   :  { %10 = vsyncpa [#allocation7 + $0x1], 0  ;;  %s843_s9 = smov 0   ;;  %s845_s10 = smov 0  }
   0x3   :  { %s847_s11 = smov 0   ;;  %s849_s12 = smov 0  }
   0x4   :  { %s851_s13 = smov 0   ;;  %s853_s14 = smov 0  }
   0x5 LB: > { %s553_s15 = sadd.s32 4294967295, %s818_s14   ;;  %s25_s16 = sadd.s32 1, %s814_s13  ;;  %s818_s14 = sphi %s853_s14, %s16_s14   ;;  %s814_s13 = sphi %s851_s13, %s1066_s13   ;;  %s810_s12 = sphi %s849_s12, %s1065_s12   ;;  %s806_s11 = sphi %s847_s11, %s1064_s11   ;;  %s802_s10 = sphi %s845_s10, %s1063_s10   ;;  %s798_s9 = sphi %s843_s9, %s1062_s9  }
   0x6   : > { %p26_p0 = scmp.ge.s32.totalorder %s25_s16, 4  ;;  %s61_s17 = sadd.s32 1, %s806_s11 }
   0x7   : > { %p68_p1 = scmp.ne.s32.totalorder %s806_s11, %s802_s10  ;;  %p69_p2 = scmp.eq.s32.totalorder %s818_s14, 0 }
   0x8   : > { %s1068_s16 = smov (%p26_p0, %s25_s16), 0  ;;  %p74_p4 = scmp.ne.s32.totalorder %s802_s10, %s798_s9 }
   0x9   : > { %p879_p3 = por %p69_p2, %p68_p1  ;;  %s58_s19 = ssub.s32 %s814_s13, %s1068_s16 }
   0xa   : > { %p886_p5 = scmp.eq.s32.totalorder %s553_s15, 0  ;;  %p59_p6 = scmp.eq.s32.totalorder %s58_s19, 0 }
   0xb   : > { %s1053_s18 = scalar_select %p879_p3, 1, 0 }
   0xc   : > { %s1054_s20 = scalar_select %p886_p5, 1, 0 }
   0xd   : > { %p554_p7 = scmp.ge.s32.totalorder %s818_s14, 1  ;;  %p893_p8 = por %p886_p5, %p74_p4 }
   0xe   : > { %p111_p9 = scmp.lt.s32.totalorder %s818_s14, 5  ;;  %s820_s24 = smov [#allocation4]  }
   0xf   : > { %s1055_s21 = scalar_select %p893_p8, 1, 0 }
  0x10   : > { %s899_s22 = scalar_select %p59_p6, %s806_s11, %s61_s17  }
  0x11   : > { %p901_p10 = pnand %p554_p7, %p111_p9  ;;  %s126_s25 = sshll.u32 %s820_s24, 4  ;;  %s127_s25 = int_to_ptr.vmem [resolvable:$true] %s126_s25 }
  0x12   : > { %s708_s29 = scalar_lea.hbm %s1046_s0, 128 }
  0x13   : > { %s1056_s23 = scalar_select %p901_p10, 1, 0 }
  0x14   : > { %p615_p11 = pneg %p901_p10  ;;  %p709_p13 = scmp.ne.s32.totalorder %s1046_s0, %s708_s29 }
  0x15   : > { %p715_p4 = scmp.lt.u32.totalorder %s708_s29, %s1046_s0 }
  0x16   : > { %p909_p12 = pnand %p615_p11, %p886_p5 }
  0x18   : > { %p710_p0 = pneg %p909_p12 }
  0x1a   : > { %p711_p1 = pnand %p710_p0, %p709_p13 }
  0x1c   : > { %p712_p2 = pneg %p711_p1 }
  0x1e   : > { %p717_p6 = pnand %p715_p4, %p712_p2 }
  0x20   : > { %720 = shalt.err (!%p717_p6)
}
  0x21   : > { %s721_s6 = scalar_lea.vmem %s127_s25, 128  ;;  %p729_p8 = scmp.lt.s32.totalorder %s127_s25, %s127_s25 }
  0x22   : > { %p722_p7 = scmp.ne.s32.totalorder %s127_s25, %s721_s6  ;;  %p730_p5 = scmp.lt.s32.totalorder %s721_s6, %s721_s6 }
  0x24   : > { %p724_p9 = pnand %p722_p7, %p710_p0  ;;  %p731_p10 = por %p730_p5, %p729_p8 }
  0x26   : > { %p725_p11 = pneg %p724_p9 }
  0x28   : > { %p732_p3 = pnand %p731_p10, %p725_p11 }
  0x2a   : > { %735 = shalt.err (!%p732_p3)
}
  0x2b   : > { %618 = dma.hbm_to_vmem [thread:$0]  (!%p909_p12), %s1046_s0, 128, %s127_s25, [#allocation5]  }
  0x2c   : > { %p556_p13 = scmp.ge.s32.totalorder %s818_s14, 4 }
  0x2d   : > { %p1058_p1 = scmp.ne.s32.totalorder (!%p556_p13), %s1053_s18, 0 }
  0x2e   : > { %133 = sbr.rel (%p556_p13) target bundleno = 88 (0x58), region = 20 }
  0x35   : > { %136 = sbr.rel (!%p1058_p1) target bundleno = 88 (0x58), region = 24  ;;  %s137_s9 = sand.u32 (%p1058_p1), 1, %s806_s11  }
  0x36   : > { %s558_s15 = sshll.u32 (%p1058_p1), %s814_s13, 5  ;;  %s557_s17 = sshll.u32 (%p1058_p1), %s137_s9, 7 }
  0x37   : > { %s143_s19 = ssub.s32 (%p1058_p1), 125, %s558_s15  ;;  %s937_s27 = scalar_lea.sflag (%p1058_p1), [#allocation7], %s137_s9 }
  0x38   : > { %p144_p5 = scmp.lt.s32.totalorder (%p1058_p1), %s143_s19, 32  ;;  %s141_s25 = scalar_lea.vmem (%p1058_p1), [#allocation6], %s557_s17 }
  0x3c   : > { %s1070_s19 = smov (!%p144_p5, %s143_s19), 32 }
  0x3d   : > { %s934_s24 = sshll.u32 %s1070_s19, 6 }
  0x3e   : > { %s148_s26 = ssub.s32 2048, %s934_s24 }
  0x3f   : > { %149 = vsyncadd %s937_s27, %s148_s26  ;;  %p560_p3 = scmp.ne.s32.totalorder %s934_s24, 0  ;;  %s591_s18 = sshll.u32 %s814_s13, 11 }
  0x40   : > { %s945_s30 = scalar_lea.hbm %s1047_s1, %s591_s18  ;;  %s154_s3 = sshll.u32 %s141_s25, 4  ;;  %s947_s3 = int_to_ptr.vmem [resolvable:$true] %s154_s3 }
  0x41   : > { %s736_s4 = scalar_lea.hbm %s945_s30, %s934_s24  ;;  %s740_s7 = scalar_lea.hbm %s1047_s1, 8000 }
  0x42   : > { %p737_p8 = scmp.ne.s32.totalorder %s945_s30, %s736_s4  ;;  %p741_p0 = scmp.lt.u32.totalorder %s945_s30, %s1047_s1 }
  0x43   : > { %p742_p2 = scmp.lt.u32.totalorder %s740_s7, %s736_s4  ;;  %p744_p6 = scmp.lt.u32.totalorder %s736_s4, %s945_s30 }
  0x44   : > { %p738_p10 = pnand %p737_p8, %p560_p3 }
  0x45   : > { %p743_p4 = por %p742_p2, %p741_p0 }
  0x46   : > { %p739_p12 = pneg %p738_p10 }
  0x47   : > { %p745_p7 = por %p744_p6, %p743_p4 }
  0x49   : > { %p746_p9 = pnand %p745_p7, %p739_p12 }
  0x4b   : > { %749 = shalt.err (!%p746_p9)
}
  0x4c   : > { %s750_s15 = scalar_lea.vmem %s947_s3, %s934_s24  ;;  %s821_s17 = smov [#allocation6]  }
  0x4d   : > { %p751_p11 = scmp.ne.s32.totalorder %s947_s3, %s750_s15  ;;  %s754_s19 = sshll.u32 %s821_s17, 4  ;;  %s755_s19 = int_to_ptr.vmem [resolvable:$false] %s754_s19 }
  0x4e   : > { %s756_s26 = scalar_lea.vmem %s755_s19, 4096  ;;  %p757_p5 = scmp.lt.s32.totalorder %s947_s3, %s755_s19 }
  0x4f   : > { %p752_p13 = pnand %p751_p11, %p560_p3  ;;  %p758_p8 = scmp.lt.s32.totalorder %s756_s26, %s750_s15 }
  0x51   : > { %p753_p1 = pneg %p752_p13  ;;  %p759_p10 = por %p758_p8, %p757_p5 }
  0x53   : > { %p760_p0 = pnand %p759_p10, %p753_p1 }
  0x55   : > { %763 = shalt.err (!%p760_p0)
}
  0x56   : > { %s822_s25 = smov 64   ;;  %s823_s18 = smov 4  }
  0x57   : > { %160 = dma.hbm_to_vmem [thread:$0]  (%p560_p3), %s945_s30, %s934_s24, %s947_s3, %s937_s27, %s822_s25, %s822_s25, %s823_s18  }
  0x58 PF: > { %p1059_p12 = scmp.ne.s32.totalorder %s1056_s23, 0 }
  0x59   : > { %p1060_p2 = scmp.ne.s32.totalorder (!%p1059_p12), %s1054_s20, 0 }
  0x5a   : > { %166 = sbr.rel (%p1059_p12) target bundleno = 1288 (0x508), region = 28 }
  0x61   : > { %789 = dma.done.wait (%p1060_p2), [#allocation5], 128  }
  0x62   : > { %791 = vsyncadd (%p1060_p2), [#allocation5], 4294967168  ;;  %s172_s28 = sand.u32 1, %s802_s10   ;;  %p1061_p4 = scmp.ne.s32.totalorder %s1055_s21, 0 }
  0x63   : > { %s566_s29 = sshll.u32 %s172_s28, 7  ;;  %s173_s4 = scalar_lea.sflag [#allocation7], %s172_s28 }
  0x64   : > { %s981_s5 = scalar_lea.vmem [#allocation6], %s566_s29 }
  0x65   : > { %793 = dma.done.wait (%p1061_p4), %s173_s4, 2048  }
  0x66   : > { %795 = vsyncadd (%p1061_p4), %s173_s4, 4294965248  ;;  %p567_p3 = scmp.ne.s32.totalorder %s810_s12, 0 }
  0x67   : > { %vm210_vm0 = vcmask (!%p567_p3), 7168   ;;  %v824_v0 = vmov (!%p567_p3), -inf   ;;  %v825_v1 = vmov (!%p567_p3), 0.0  }
  0x68   : > { %209 = sbr.rel (%p567_p3) target bundleno = 111 (0x6f), region = 40  ;;  %211 = vst.msk [vmem:[#allocation2] sm:$0xff] (!%p567_p3), %vm210_vm0, %v824_v0  ;;  %212 = vst.msk [vmem:[#allocation3] sm:$0xff] (!%p567_p3), %vm210_vm0, %v825_v1 }
  0x6f PF: > { %v676_v2 = vld [vmem:[%s981_s5 + $0x40] sm:$0xff]   ;;  %v678_v4 = vld [vmem:[%s981_s5 + $0x48] sm:$0xff]   ;;  %v680_v6 = vld [vmem:[%s981_s5 + $0x50] sm:$0xff]   ;;  %p584_p6 = scmp.ne.s32.totalorder %s810_s12, 3 }
  0x70   : > { %v677_v3 = vld [vmem:[%s981_s5] sm:$0xff]   ;;  %592 = vmatprep.subr.bf16.mxu0 %v676_v2  ;;  %v679_v5 = vld [vmem:[%s981_s5 + $0x8] sm:$0xff]   ;;  %v681_v7 = vld [vmem:[%s981_s5 + $0x10] sm:$0xff]   ;;  %v388_v24 = vlaneseq (!%p584_p6)  ;;  %s585_s20 = sshll.u32 (!%p584_p6), %s810_s12, 8  ;;  %v826_v33 = vmov (!%p584_p6), 0   ;;  %vm424_vm3 = vcmask (!%p584_p6), 7168  }
  0x71   : > { %593 = vmatpush3.bf16.xpose.msra.mxu0 %v677_v3  ;;  %v682_v8 = vld [vmem:[%s981_s5 + $0x58] sm:$0xff]   ;;  %v684_v12 = vld [vmem:[%s981_s5 + $0x60] sm:$0xff]   ;;  %v686_v14 = vld [vmem:[%s981_s5 + $0x68] sm:$0xff]   ;;  %v392_v25 = vstv (!%p584_p6), %s585_s20  ;;  %692 = vset.pattern.permute.xlu0 (!%p584_p6), %v826_v33 }
  0x72   : > { %594 = vmatprep.subr.bf16.mxu0 %v678_v4  ;;  %v213_v9 = vld [vmem:[#allocation4] sm:$0xff]  ;;  %v685_v13 = vld [vmem:[%s981_s5 + $0x20] sm:$0xff]   ;;  %v687_v15 = vld [vmem:[%s981_s5 + $0x28] sm:$0xff]   ;;  %v389_v26 = vand.u32 (!%p584_p6), 127, %v388_v24 }
  0x73   : > { %v214_v10 = vpack.c.bf16 %v213_v9, %v213_v9  ;;  %v683_v11 = vld [vmem:[%s981_s5 + $0x18] sm:$0xff]   ;;  %v688_v16 = vld [vmem:[%s981_s5 + $0x70] sm:$0xff]   ;;  %v399_v34 = vld [vmem:[#allocation2] sm:$0xff] (!%p584_p6) }
  0x74   : > { %v689_v17 = vld [vmem:[%s981_s5 + $0x30] sm:$0xff]   ;;  %v690_v18 = vld [vmem:[%s981_s5 + $0x78] sm:$0xff]   ;;  %v390_v27 = vadd.s32 (!%p584_p6), 128, %v389_v26  ;;  %v393_v28 = vadd.s32 (!%p584_p6), %v392_v25, %v389_v26 }
  0x75   : > { %608 = vmatprep.mubr.bf16.mxu0 %v214_v10  ;;  %v691_v19 = vld [vmem:[%s981_s5 + $0x38] sm:$0xff]   ;;  %v404_v48 = vld [vmem:[#allocation3] sm:$0xff] (!%p584_p6) }
  0x76   : > { %v394_v29 = vadd.s32 (!%p584_p6), %v392_v25, %v390_v27  ;;  %vm395_vm1 = vcmp.lt.s32.totalorder (!%p584_p6), %v393_v28, 1000 }
  0x78   : > { %vm396_vm2 = vcmp.lt.s32.totalorder (!%p584_p6), %v394_v29, 1000 }
  0x79   : > { %595 = vmatpush3.bf16.xpose.msra.mxu0 %v679_v5 }
  0x7a   : > { %596 = vmatprep.subr.bf16.mxu0 %v680_v6 }
  0x81   : > { %597 = vmatpush3.bf16.xpose.msra.mxu0 %v681_v7 }
  0x82   : > { %598 = vmatprep.subr.bf16.mxu0 %v682_v8 }
  0x89   : > { %599 = vmatpush3.bf16.xpose.msra.mxu0 %v683_v11 }
  0x8a   : > { %600 = vmatprep.subr.bf16.mxu0 %v684_v12 }
  0x91   : > { %601 = vmatpush3.bf16.xpose.msra.mxu0 %v685_v13 }
  0x92   : > { %602 = vmatprep.subr.bf16.mxu0 %v686_v14 }
  0x99   : > { %603 = vmatpush3.bf16.xpose.msra.mxu0 %v687_v15 }
  0x9a   : > { %604 = vmatprep.subr.bf16.mxu0 %v688_v16 }
  0xa1   : > { %605 = vmatpush3.bf16.xpose.msra.mxu0 %v689_v17 }
  0xa2   : > { %606 = vmatprep.subr.bf16.mxu0 %v690_v18 }
  0xa9   : > { %607 = vmatpush3.bf16.xpose.msra.mxu0 %v691_v19 }
  0xb0   : > { %609 = vmatmul.mubr.bf16.vlgmr.msra.gmra.mrb[0].mxu0 %v214_v10 }
 0x180   : > { %387 = sbr.rel (%p584_p6) target bundleno = 827 (0x33b), region = 44 }
 0x183   : > { %v1004_v20 = vpop.f32.mrb[0].mxu0 }
 0x184   : > { %v1006_v21 = vpop.f32.mrb[1].mxu0  ;;  %v397_v30 = vsel (!%p584_p6), %vm395_vm1, %v1004_v20, -inf }
 0x185   : > { %v381_v22 = vpop.f32.mrb[2].mxu0  ;;  %v398_v31 = vsel (!%p584_p6), %vm396_vm2, %v1006_v21, -inf }
 0x186   : > { %v382_v23 = vpop.f32.mrb[3].mxu0  ;;  %v400_v32 = vmax.f32 (!%p584_p6), %v397_v30, %v398_v31 }
 0x188   : > { %401 = vmax.xlane.f32.xlu0 %v400_v32 }
 0x215   : > { %v402_v35 = vpop.xlane.xlu0 %401 }
 0x216   : > { %v403_v36 = vmax.f32 %v399_v34, %v402_v35 }
 0x218   : > { %v405_v37 = vsub.f32 %v399_v34, %v403_v36  ;;  %426 = vst.msk [vmem:[#allocation2] sm:$0xff] %vm424_vm3, %v403_v36  ;;  %411 = vperm.xlu0 %692, %v403_v36  }
 0x21a   : > { %v406_v46 = vmul.f32 1.442695, %v405_v37 }
 0x297   : > { %v412_v38 = vpop.permute.xlu0 %411 }
 0x298   : > { %v414_v39 = vsub.f32 %v397_v30, %v412_v38  ;;  %v415_v40 = vsub.f32 %v398_v31, %v412_v38 }
 0x29a   : > { %v416_v41 = vmul.f32 1.442695, %v414_v39  ;;  %v418_v42 = vmul.f32 1.442695, %v415_v40 }
 0x29c   : > { %693 = vpow2.f32 %v416_v41 }
 0x29d   : > { %695 = vpow2.f32 %v418_v42 }
 0x29e   : > { %697 = vpow2.f32 %v406_v46 }
 0x2a6   : > { %v694_v43 = vpop.eup %693 }
 0x2a7   : > { %v696_v44 = vpop.eup %695 }
 0x2a8   : > { %v420_v45 = vadd.f32 %v696_v44, %v694_v43  ;;  %v698_v47 = vpop.eup %697 }
 0x2a9   : > { %v408_v49 = vmul.f32 %v698_v47, %v404_v48 }
 0x2aa   : > { %421 = vadd.xlane.f32.xlu1 %v420_v45 }
 0x337   : > { %v422_v50 = vpop.xlane.xlu1 %421 }
 0x338   : > { %v423_v51 = vadd.f32 %v422_v50, %v408_v49 }
 0x33a   : > { %425 = vst.msk [vmem:[#allocation3] sm:$0xff] %vm424_vm3, %v423_v51 }
 0x33b PF: > { %p586_p7 = scmp.eq.s32.totalorder %s810_s12, 3 }
 0x33c   : > { %v432_v52 = vmax.f32 (!%p586_p7), %v1004_v20, %v1006_v21  ;;  %v827_v53 = vmov (!%p586_p7), 0   ;;  %v431_v54 = vld [vmem:[#allocation2] sm:$0xff] (!%p586_p7)  ;;  %vm456_vm4 = vcmask (!%p586_p7), 7168  }
 0x33d   : > { %430 = sbr.rel (%p586_p7) target bundleno = 1265 (0x4f1), region = 48  ;;  %699 = vset.pattern.permute.xlu0 (!%p586_p7), %v827_v53 }
 0x33e   : > { %433 = vmax.xlane.f32.xlu0 (!%p586_p7), %v432_v52 }
 0x341   : > { %v436_v4 = vld [vmem:[#allocation3] sm:$0xff] (!%p586_p7) }
 0x3cb   : > { %v434_v55 = vpop.xlane.xlu0 %433 }
 0x3cc   : > { %v435_v56 = vmax.f32 %v431_v54, %v434_v55 }
 0x3ce   : > { %v437_v57 = vsub.f32 %v431_v54, %v435_v56  ;;  %458 = vst.msk [vmem:[#allocation2] sm:$0xff] %vm456_vm4, %v435_v56  ;;  %443 = vperm.xlu0 %699, %v435_v56  }
 0x3d0   : > { %v438_v2 = vmul.f32 1.442695, %v437_v57 }
 0x44d   : > { %v444_v58 = vpop.permute.xlu0 %443 }
 0x44e   : > { %v446_v59 = vsub.f32 %v1004_v20, %v444_v58  ;;  %v447_v60 = vsub.f32 %v1006_v21, %v444_v58 }
 0x450   : > { %v448_v61 = vmul.f32 1.442695, %v446_v59  ;;  %v450_v62 = vmul.f32 1.442695, %v447_v60 }
 0x452   : > { %700 = vpow2.f32 %v448_v61 }
 0x453   : > { %702 = vpow2.f32 %v450_v62 }
 0x454   : > { %704 = vpow2.f32 %v438_v2 }
 0x45c   : > { %v701_v63 = vpop.eup %700 }
 0x45d   : > { %v703_v0 = vpop.eup %702 }
 0x45e   : > { %v452_v1 = vadd.f32 %v703_v0, %v701_v63  ;;  %v705_v3 = vpop.eup %704 }
 0x45f   : > { %v440_v5 = vmul.f32 %v705_v3, %v436_v4 }
 0x460   : > { %453 = vadd.xlane.f32.xlu1 %v452_v1 }
 0x4ed   : > { %v454_v6 = vpop.xlane.xlu1 %453 }
 0x4ee   : > { %v455_v7 = vadd.f32 %v454_v6, %v440_v5 }
 0x4f0   : > { %457 = vst.msk [vmem:[#allocation3] sm:$0xff] %vm456_vm4, %v455_v7 }
 0x4f1 PF: > { %461 = sbr.rel (%p584_p6) target bundleno = 1288 (0x508), region = 52  ;;  %v462_v10 = vld [vmem:[#allocation2] sm:$0xff] (!%p584_p6)  ;;  %vm467_vm5 = vcmask (!%p584_p6), 7168  }
 0x4f7   : > { %v463_v8 = vld [vmem:[#allocation3] sm:$0xff] (!%p584_p6) }
 0x4f8   : > { %706 = vlog2.f32 %v463_v8 }
 0x502   : > { %v707_v9 = vpop.eup %706 }
 0x503   : > { %v465_v11 = vmul.f32 0.6931472, %v707_v9 }
 0x505   : > { %v466_v12 = vadd.f32 %v465_v11, %v462_v10 }
 0x507   : > { %468 = vst.msk [vmem:[%s1048_s2] sm:$0xff] %vm467_vm5, %v466_v12 }
 0x508 PF: > { %s16_s14 = sadd.s32 1, %s818_s14   ;;  %s1062_s9 = smov %s802_s10 }
 0x509   : > { %p13_p9 = scmp.ge.s32.totalorder %s16_s14, 6   ;;  %s1063_s10 = smov %s806_s11 }
 0x50a   : > { %s1064_s11 = smov %s899_s22  ;;  %s1065_s12 = smov %s814_s13 }
 0x50b   : > { %s1066_s13 = smov %s1068_s16  ;;  %15 = sbr.rel (!%p13_p9) target bundleno = 5 (0x5), region = 90 }
 0x512   :  { %488 = vsyncpa [#allocation5], 1 }
 0x513   :  { %490 = vsyncpa [#allocation5 + $0x1], 1 }
 0x514   :  { %491 = vsyncpa [#allocation7], 1 }
 0x515   :  { %493 = vsyncpa [#allocation7 + $0x1], 1 }

</bundles_post_ra>
